<compile_context>
chip_gen: v6e
topology: v6e:2x2x1
jax: 0.10.0
libtpu: 0.0.40
codegen_flags: <defaults>
</compile_context>

<pallas_src>
from functools import partial

import jax
import jax.numpy as jnp
import numpy as np
from jax import lax
from jax.experimental import pallas as pl
from jax.experimental.pallas import tpu as pltpu


def _ceil_to(n, m):
    return -(-n // m) * m


def _padded_bytes(shape, itemsize):
    """Approximate VMEM footprint of one buffer with (8, 128) tile padding."""
    s = list(shape)
    if len(s) >= 2:
        s[-2] = _ceil_to(s[-2], 8)
    s[-1] = _ceil_to(s[-1], 128)
    n = 1
    for d in s:
        n *= d
    return n * itemsize


def _vmem_limit_bytes(bt, n, c, h, d):
    est = (
        2 * _padded_bytes((bt, n, c), 4)          # x block (double-buffered)
        + 2 * _padded_bytes((c, 3 * c), 2)        # W_qkv (bf16, resident)
        + 2 * _padded_bytes((1, d, c), 2)         # per-head W_proj slab (bf16)
        + 2 * _padded_bytes((1, c), 4)            # bias
        + 2 * _padded_bytes((bt, n, c), 4)        # output block
        + 2 * _padded_bytes((bt, 1, n, n), 4)     # per-head attention-weights block
        + 3 * _padded_bytes((h, bt * n, d), 4)    # q / k / v scratches
        + _padded_bytes((bt * n, c), 4)           # projection accumulator
        + _padded_bytes((bt * n, 3 * c), 4)       # qkv intermediate at h == 0
    )
    # 2x headroom for spills / compiler temporaries; floor 16 MiB; keep well
    # under v7x's 64 MiB physical VMEM.
    return int(min(max(2 * est, 16 * 1024 * 1024), 56 * 1024 * 1024))


def fused_attention_kernel(x_ref, wqkv_ref, wproj_ref, bproj_ref,
                           o_ref, w_ref,
                           q_s, k_s, v_s, acc_s,
                           *, num_heads, head_dim, batch_block, seq_len, scale):
    # x_ref     : (Bt, N, C)     f32   tokens for this batch block
    # wqkv_ref  : (C, 3C)        bf16  fused qkv weight (resident across grid)
    # wproj_ref : (1, D, C)      bf16  this head's slab of the output projection
    # bproj_ref : (1, C)         f32   output projection bias
    # o_ref     : (Bt, N, C)     f32   final output (written at h == H-1)
    # w_ref     : (Bt, 1, N, N)  f32   this head's softmax attention weights
    # q_s/k_s   : (H, Bt*N, D)   f32   per-head Q (pre-scaled) / K scratch
    # v_s       : (H, Bt*N, D)   f32   per-head V scratch
    # acc_s     : (Bt*N, C)      f32   output-projection accumulator
    H, D, Bt, N = num_heads, head_dim, batch_block, seq_len
    C = H * D
    h = pl.program_id(1)

    @pl.when(h == 0)
    def _project_qkv():
        # One wide bf16 MXU matmul for the whole batch block: (Bt*N, C) @ (C, 3C).
        x = x_ref[...].reshape(Bt * N, C).astype(jnp.bfloat16)
        qkv = jnp.dot(x, wqkv_ref[...], preferred_element_type=jnp.float32)
        # Split into per-head slabs once (static lane slices) so every head grid
        # step only needs cheap leading-dim indexing (no dynamic lane slicing).
        # Column layout matches torch's reshape(B, N, 3, H, D).
        for hh in range(H):
            q_s[hh] = qkv[:, hh * D:(hh + 1) * D] * scale        # fold scale into q
            k_s[hh] = qkv[:, C + hh * D:C + (hh + 1) * D]
            v_s[hh] = qkv[:, 2 * C + hh * D:2 * C + (hh + 1) * D]
        acc_s[...] = jnp.zeros(acc_s.shape, acc_s.dtype)

    q = q_s[h]            # (Bt*N, D) f32, pre-scaled
    k = k_s[h]            # (Bt*N, D) f32
    v = v_s[h]            # (Bt*N, D) f32

    ctx_rows = []
    for b in range(Bt):   # static loop: attention never mixes batch elements
        qb = q[b * N:(b + 1) * N]
        kb = k[b * N:(b + 1) * N]
        # scores (N, N) = (q * scale) @ k^T, kept in f32 (feeds returned weights)
        s = lax.dot_general(qb, kb, (((1,), (1,)), ((), ())),
                            preferred_element_type=jnp.float32)
        s = s - jnp.max(s, axis=-1, keepdims=True)
        e = jnp.exp(s)
        p = e * pl.reciprocal(jnp.sum(e, axis=-1, keepdims=True), approx=False)
        w_ref[b, 0] = p   # attn_drop is Dropout(0.0) -> identity
        ctx_rows.append(jnp.dot(p.astype(jnp.bfloat16),
                                v[b * N:(b + 1) * N].astype(jnp.bfloat16),
                                preferred_element_type=jnp.float32))
    ctx = jnp.concatenate(ctx_rows, axis=0) if Bt > 1 else ctx_rows[0]  # (Bt*N, D)

    # Per-head output-projection contribution: acc += ctx_h @ W_proj[h*D:(h+1)*D, :]
    acc_s[...] += jnp.dot(ctx.astype(jnp.bfloat16), wproj_ref[0],
                          preferred_element_type=jnp.float32)

    @pl.when(h == H - 1)
    def _finalize():
        # proj_drop is Dropout(0.0) -> identity
        out = acc_s[...] + bproj_ref[...]
        o_ref[...] = out.reshape(Bt, N, C).astype(o_ref.dtype)


def attention_forward(x, w_qkv, w_proj, b_proj, num_heads, batch_block=None):
    """Pallas implementation of TOSICA Attention.forward. Returns (out, weights)."""
    B, N, C = x.shape
    H = num_heads
    assert C % H == 0
    D = C // H
    scale = float(D) ** -0.5

    # Batch-block to fill MXU rows (~256 on v6e/v7x) in the two big matmuls.
    # (When B is large this also leaves >= 2 parallel batch steps for multi-TC
    # chips; at B == 2 row-fill is preferred since it is the bigger lever.)
    if batch_block is None:
        batch_block = max(1, 256 // max(N, 1))
    bt = int(max(1, min(batch_block, B)))
    while B % bt:
        bt -= 1

    # bf16 MXU operands (f32 accumulation happens inside the kernel).
    w_qkv_b = w_qkv.astype(jnp.bfloat16)                        # (C, 3C)
    w_proj_h = w_proj.reshape(H, D, C).astype(jnp.bfloat16)     # per-head slabs
    b_proj2 = jnp.asarray(b_proj, jnp.float32).reshape(1, C)

    vmem_limit = _vmem_limit_bytes(bt, N, C, H, D)

    out, weights = pl.pallas_call(
        partial(fused_attention_kernel, num_heads=H, head_dim=D,
                batch_block=bt, seq_len=N, scale=scale),
        out_shape=(
            jax.ShapeDtypeStruct((B, N, C), jnp.float32),
            jax.ShapeDtypeStruct((B, H, N, N), jnp.float32),
        ),
        grid=(B // bt, H),
        in_specs=[
            pl.BlockSpec((bt, N, C), lambda b, h: (b, 0, 0)),
            pl.BlockSpec((C, 3 * C), lambda b, h: (0, 0)),      # resident across grid
            pl.BlockSpec((1, D, C), lambda b, h: (h, 0, 0)),    # this head's proj slab
            pl.BlockSpec((1, C), lambda b, h: (0, 0)),
        ],
        out_specs=(
            pl.BlockSpec((bt, N, C), lambda b, h: (b, 0, 0)),
            pl.BlockSpec((bt, 1, N, N), lambda b, h: (b, h, 0, 0)),
        ),
        scratch_shapes=[
            pltpu.VMEM((H, bt * N, D), jnp.float32),   # q (pre-scaled)
            pltpu.VMEM((H, bt * N, D), jnp.float32),   # k
            pltpu.VMEM((H, bt * N, D), jnp.float32),   # v
            pltpu.VMEM((bt * N, C), jnp.float32),      # projection accumulator
        ],
        compiler_params=pltpu.CompilerParams(
            dimension_semantics=("parallel", "arbitrary"),
            vmem_limit_bytes=vmem_limit),
    )(x, w_qkv_b, w_proj_h, b_proj2)

    return out, weights


def reference_forward(x, w_qkv, w_proj, b_proj, num_heads):
    """Pure-JAX (f32) reference mirroring the PyTorch module exactly."""
    B, N, C = x.shape
    H = num_heads
    D = C // H
    scale = float(D) ** -0.5
    qkv = (x @ w_qkv).reshape(B, N, 3, H, D).transpose(2, 0, 3, 1, 4)
    q, k, v = qkv[0], qkv[1], qkv[2]
    attn = (q @ jnp.swapaxes(k, -2, -1)) * scale
    attn = jax.nn.softmax(attn, axis=-1)
    out = (attn @ v).transpose(0, 2, 1, 3).reshape(B, N, C)
    out = out @ w_proj + b_proj
    return out, attn


if __name__ == "__main__":
    # Small shapes consistent with the module: dim divisible by num_heads.
    B, N, C = 2, 8, 32
    num_heads = 8

    key = jax.random.PRNGKey(0)
    kx, kqkv, kproj, kb = jax.random.split(key, 4)

    x = jax.random.normal(kx, (B, N, C), dtype=jnp.float32)
    # nn.Linear(dim, 3*dim, bias=False): weight (3C, C); stored pre-transposed
    # as (C, 3C) so the kernel computes x @ W directly.
    w_qkv = jax.random.normal(kqkv, (C, 3 * C), dtype=jnp.float32) * 0.05
    # nn.Linear(dim, dim): weight stored in x @ W layout (C, C) + bias (C,)
    w_proj = jax.random.normal(kproj, (C, C), dtype=jnp.float32) * 0.05
    b_proj = jax.random.normal(kb, (C,), dtype=jnp.float32) * 0.05

    out, weights = attention_forward(x, w_qkv, w_proj, b_proj, num_heads)
    out = jax.block_until_ready(out)
    weights = jax.block_until_ready(weights)

    ref_out, ref_w = reference_forward(x, w_qkv, w_proj, b_proj, num_heads)

    assert out.shape == (B, N, C)
    assert weights.shape == (B, num_heads, N, N)
    # Tolerances relaxed vs. the pure-f32 version because MXU operands are bf16
    # (f32 accumulation); softmax / scores stay f32.
    np.testing.assert_allclose(np.asarray(out), np.asarray(ref_out),
                               rtol=2e-2, atol=2e-2)
    np.testing.assert_allclose(np.asarray(weights), np.asarray(ref_w),
                               rtol=2e-2, atol=2e-2)

    print("KERNEL_OK")
</pallas_src>

<mosaic_0001>
module attributes {stable_mosaic.version = 11 : i64} {
  func.func @fused_attention_kernel(%arg0: i32, %arg1: i32, %arg2: memref<2x8x32xf32, #tpu.memory_space<vmem>>, %arg3: memref<32x96xbf16, #tpu.memory_space<vmem>>, %arg4: memref<1x4x32xbf16, #tpu.memory_space<vmem>>, %arg5: memref<1x32xf32, #tpu.memory_space<vmem>>, %arg6: memref<2x8x32xf32, #tpu.memory_space<vmem>>, %arg7: memref<2x1x8x8xf32, #tpu.memory_space<vmem>>, %arg8: memref<8x16x4xf32, #tpu.memory_space<vmem>>, %arg9: memref<8x16x4xf32, #tpu.memory_space<vmem>>, %arg10: memref<8x16x4xf32, #tpu.memory_space<vmem>>, %arg11: memref<16x32xf32, #tpu.memory_space<vmem>>) attributes {dimension_semantics = [#tpu.dimension_semantics<parallel>, #tpu.dimension_semantics<arbitrary>], iteration_bounds = array<i64: 1, 8>, scalar_prefetch = 0 : i64, scratch_operands = 4 : i64, tpu.core_type = #tpu.core_type<tc>, window_params = [{transform_indices = @transform_0, window_bounds = array<i64: 2, 8, 32>}, {pipeline_mode = #tpu.pipeline_mode<synchronous>, transform_indices = @transform_1, window_bounds = array<i64: 32, 96>}, {transform_indices = @transform_2, window_bounds = array<i64: 1, 4, 32>}, {pipeline_mode = #tpu.pipeline_mode<synchronous>, transform_indices = @transform_3, window_bounds = array<i64: 1, 32>}, {transform_indices = @transform_4, window_bounds = array<i64: 2, 8, 32>}, {transform_indices = @transform_5, window_bounds = array<i64: 2, 1, 8, 8>}]} {
    %c0_i32 = arith.constant 0 : i32
    %0 = arith.cmpi eq, %arg1, %c0_i32 : i32
    %1 = arith.extui %0 : i1 to i32
    %c0_i32_0 = arith.constant 0 : i32
    %2 = arith.cmpi ne, %1, %c0_i32_0 : i32
    scf.if %2 {
      %c0_29 = arith.constant 0 : index
      %c0_30 = arith.constant 0 : index
      %c0_31 = arith.constant 0 : index
      %63 = vector.load %arg2[%c0_29, %c0_30, %c0_31] : memref<2x8x32xf32, #tpu.memory_space<vmem>>, vector<2x8x32xf32>
      %64 = vector.shape_cast %63 : vector<2x8x32xf32> to vector<16x32xf32>
      %65 = arith.truncf %64 : vector<16x32xf32> to vector<16x32xbf16>
      %c0_32 = arith.constant 0 : index
      %c0_33 = arith.constant 0 : index
      %66 = vector.load %arg3[%c0_32, %c0_33] : memref<32x96xbf16, #tpu.memory_space<vmem>>, vector<32x96xbf16>
      %cst_34 = arith.constant dense<0.000000e+00> : vector<16x96xf32>
      %67 = tpu.matmul %65, %66, %cst_34 {dimension_numbers = #tpu.dot_dimension_numbers<[1], [0], [0], [1], [0, 0, 1, 1], [], []>} : vector<16x32xbf16>, vector<32x96xbf16>, vector<16x96xf32> -> vector<16x96xf32>
      %68 = vector.extract_strided_slice %67 {offsets = [0, 0], sizes = [16, 4], strides = [1, 1]} : vector<16x96xf32> to vector<16x4xf32>
      %cst_35 = arith.constant 5.000000e-01 : f32
      %69 = vector.broadcast %cst_35 : f32 to vector<16x4xf32>
      %70 = arith.mulf %68, %69 : vector<16x4xf32>
      %c0_36 = arith.constant 0 : index
      %c0_37 = arith.constant 0 : index
      %c0_38 = arith.constant 0 : index
      %71 = vector.load %arg8[%c0_36, %c0_37, %c0_38] : memref<8x16x4xf32, #tpu.memory_space<vmem>>, vector<1x16x4xf32>
      %72 = vector.shape_cast %71 : vector<1x16x4xf32> to vector<16x4xf32>
      %73 = vector.shape_cast %70 : vector<16x4xf32> to vector<1x16x4xf32>
      tpu.vector_store %arg8[%c0_36, %c0_37, %c0_38], %73 {strides = array<i32>} : memref<8x16x4xf32, #tpu.memory_space<vmem>>, vector<1x16x4xf32>,
      %74 = vector.extract_strided_slice %67 {offsets = [0, 32], sizes = [16, 4], strides = [1, 1]} : vector<16x96xf32> to vector<16x4xf32>
      %c0_39 = arith.constant 0 : index
      %c0_40 = arith.constant 0 : index
      %c0_41 = arith.constant 0 : index
      %75 = vector.load %arg9[%c0_39, %c0_40, %c0_41] : memref<8x16x4xf32, #tpu.memory_space<vmem>>, vector<1x16x4xf32>
      %76 = vector.shape_cast %75 : vector<1x16x4xf32> to vector<16x4xf32>
      %77 = vector.shape_cast %74 : vector<16x4xf32> to vector<1x16x4xf32>
      tpu.vector_store %arg9[%c0_39, %c0_40, %c0_41], %77 {strides = array<i32>} : memref<8x16x4xf32, #tpu.memory_space<vmem>>, vector<1x16x4xf32>,
      %78 = vector.extract_strided_slice %67 {offsets = [0, 64], sizes = [16, 4], strides = [1, 1]} : vector<16x96xf32> to vector<16x4xf32>
      %c0_42 = arith.constant 0 : index
      %c0_43 = arith.constant 0 : index
      %c0_44 = arith.constant 0 : index
      %79 = vector.load %arg10[%c0_42, %c0_43, %c0_44] : memref<8x16x4xf32, #tpu.memory_space<vmem>>, vector<1x16x4xf32>
      %80 = vector.shape_cast %79 : vector<1x16x4xf32> to vector<16x4xf32>
      %81 = vector.shape_cast %78 : vector<16x4xf32> to vector<1x16x4xf32>
      tpu.vector_store %arg10[%c0_42, %c0_43, %c0_44], %81 {strides = array<i32>} : memref<8x16x4xf32, #tpu.memory_space<vmem>>, vector<1x16x4xf32>,
      %82 = vector.extract_strided_slice %67 {offsets = [0, 4], sizes = [16, 4], strides = [1, 1]} : vector<16x96xf32> to vector<16x4xf32>
      %cst_45 = arith.constant 5.000000e-01 : f32
      %83 = vector.broadcast %cst_45 : f32 to vector<16x4xf32>
      %84 = arith.mulf %82, %83 : vector<16x4xf32>
      %c1_46 = arith.constant 1 : index
      %c0_47 = arith.constant 0 : index
      %c0_48 = arith.constant 0 : index
      %85 = vector.load %arg8[%c1_46, %c0_47, %c0_48] : memref<8x16x4xf32, #tpu.memory_space<vmem>>, vector<1x16x4xf32>
      %86 = vector.shape_cast %85 : vector<1x16x4xf32> to vector<16x4xf32>
      %87 = vector.shape_cast %84 : vector<16x4xf32> to vector<1x16x4xf32>
      tpu.vector_store %arg8[%c1_46, %c0_47, %c0_48], %87 {strides = array<i32>} : memref<8x16x4xf32, #tpu.memory_space<vmem>>, vector<1x16x4xf32>,
      %88 = vector.extract_strided_slice %67 {offsets = [0, 36], sizes = [16, 4], strides = [1, 1]} : vector<16x96xf32> to vector<16x4xf32>
      %c1_49 = arith.constant 1 : index
      %c0_50 = arith.constant 0 : index
      %c0_51 = arith.constant 0 : index
      %89 = vector.load %arg9[%c1_49, %c0_50, %c0_51] : memref<8x16x4xf32, #tpu.memory_space<vmem>>, vector<1x16x4xf32>
      %90 = vector.shape_cast %89 : vector<1x16x4xf32> to vector<16x4xf32>
      %91 = vector.shape_cast %88 : vector<16x4xf32> to vector<1x16x4xf32>
      tpu.vector_store %arg9[%c1_49, %c0_50, %c0_51], %91 {strides = array<i32>} : memref<8x16x4xf32, #tpu.memory_space<vmem>>, vector<1x16x4xf32>,
      %92 = vector.extract_strided_slice %67 {offsets = [0, 68], sizes = [16, 4], strides = [1, 1]} : vector<16x96xf32> to vector<16x4xf32>
      %c1_52 = arith.constant 1 : index
      %c0_53 = arith.constant 0 : index
      %c0_54 = arith.constant 0 : index
      %93 = vector.load %arg10[%c1_52, %c0_53, %c0_54] : memref<8x16x4xf32, #tpu.memory_space<vmem>>, vector<1x16x4xf32>
      %94 = vector.shape_cast %93 : vector<1x16x4xf32> to vector<16x4xf32>
      %95 = vector.shape_cast %92 : vector<16x4xf32> to vector<1x16x4xf32>
      tpu.vector_store %arg10[%c1_52, %c0_53, %c0_54], %95 {strides = array<i32>} : memref<8x16x4xf32, #tpu.memory_space<vmem>>, vector<1x16x4xf32>,
      %96 = vector.extract_strided_slice %67 {offsets = [0, 8], sizes = [16, 4], strides = [1, 1]} : vector<16x96xf32> to vector<16x4xf32>
      %cst_55 = arith.constant 5.000000e-01 : f32
      %97 = vector.broadcast %cst_55 : f32 to vector<16x4xf32>
      %98 = arith.mulf %96, %97 : vector<16x4xf32>
      %c2 = arith.constant 2 : index
      %c0_56 = arith.constant 0 : index
      %c0_57 = arith.constant 0 : index
      %99 = vector.load %arg8[%c2, %c0_56, %c0_57] : memref<8x16x4xf32, #tpu.memory_space<vmem>>, vector<1x16x4xf32>
      %100 = vector.shape_cast %99 : vector<1x16x4xf32> to vector<16x4xf32>
      %101 = vector.shape_cast %98 : vector<16x4xf32> to vector<1x16x4xf32>
      tpu.vector_store %arg8[%c2, %c0_56, %c0_57], %101 {strides = array<i32>} : memref<8x16x4xf32, #tpu.memory_space<vmem>>, vector<1x16x4xf32>,
      %102 = vector.extract_strided_slice %67 {offsets = [0, 40], sizes = [16, 4], strides = [1, 1]} : vector<16x96xf32> to vector<16x4xf32>
      %c2_58 = arith.constant 2 : index
      %c0_59 = arith.constant 0 : index
      %c0_60 = arith.constant 0 : index
      %103 = vector.load %arg9[%c2_58, %c0_59, %c0_60] : memref<8x16x4xf32, #tpu.memory_space<vmem>>, vector<1x16x4xf32>
      %104 = vector.shape_cast %103 : vector<1x16x4xf32> to vector<16x4xf32>
      %105 = vector.shape_cast %102 : vector<16x4xf32> to vector<1x16x4xf32>
      tpu.vector_store %arg9[%c2_58, %c0_59, %c0_60], %105 {strides = array<i32>} : memref<8x16x4xf32, #tpu.memory_space<vmem>>, vector<1x16x4xf32>,
      %106 = vector.extract_strided_slice %67 {offsets = [0, 72], sizes = [16, 4], strides = [1, 1]} : vector<16x96xf32> to vector<16x4xf32>
      %c2_61 = arith.constant 2 : index
      %c0_62 = arith.constant 0 : index
      %c0_63 = arith.constant 0 : index
      %107 = vector.load %arg10[%c2_61, %c0_62, %c0_63] : memref<8x16x4xf32, #tpu.memory_space<vmem>>, vector<1x16x4xf32>
      %108 = vector.shape_cast %107 : vector<1x16x4xf32> to vector<16x4xf32>
      %109 = vector.shape_cast %106 : vector<16x4xf32> to vector<1x16x4xf32>
      tpu.vector_store %arg10[%c2_61, %c0_62, %c0_63], %109 {strides = array<i32>} : memref<8x16x4xf32, #tpu.memory_space<vmem>>, vector<1x16x4xf32>,
      %110 = vector.extract_strided_slice %67 {offsets = [0, 12], sizes = [16, 4], strides = [1, 1]} : vector<16x96xf32> to vector<16x4xf32>
      %cst_64 = arith.constant 5.000000e-01 : f32
      %111 = vector.broadcast %cst_64 : f32 to vector<16x4xf32>
      %112 = arith.mulf %110, %111 : vector<16x4xf32>
      %c3 = arith.constant 3 : index
      %c0_65 = arith.constant 0 : index
      %c0_66 = arith.constant 0 : index
      %113 = vector.load %arg8[%c3, %c0_65, %c0_66] : memref<8x16x4xf32, #tpu.memory_space<vmem>>, vector<1x16x4xf32>
      %114 = vector.shape_cast %113 : vector<1x16x4xf32> to vector<16x4xf32>
      %115 = vector.shape_cast %112 : vector<16x4xf32> to vector<1x16x4xf32>
      tpu.vector_store %arg8[%c3, %c0_65, %c0_66], %115 {strides = array<i32>} : memref<8x16x4xf32, #tpu.memory_space<vmem>>, vector<1x16x4xf32>,
      %116 = vector.extract_strided_slice %67 {offsets = [0, 44], sizes = [16, 4], strides = [1, 1]} : vector<16x96xf32> to vector<16x4xf32>
      %c3_67 = arith.constant 3 : index
      %c0_68 = arith.constant 0 : index
      %c0_69 = arith.constant 0 : index
      %117 = vector.load %arg9[%c3_67, %c0_68, %c0_69] : memref<8x16x4xf32, #tpu.memory_space<vmem>>, vector<1x16x4xf32>
      %118 = vector.shape_cast %117 : vector<1x16x4xf32> to vector<16x4xf32>
      %119 = vector.shape_cast %116 : vector<16x4xf32> to vector<1x16x4xf32>
      tpu.vector_store %arg9[%c3_67, %c0_68, %c0_69], %119 {strides = array<i32>} : memref<8x16x4xf32, #tpu.memory_space<vmem>>, vector<1x16x4xf32>,
      %120 = vector.extract_strided_slice %67 {offsets = [0, 76], sizes = [16, 4], strides = [1, 1]} : vector<16x96xf32> to vector<16x4xf32>
      %c3_70 = arith.constant 3 : index
      %c0_71 = arith.constant 0 : index
      %c0_72 = arith.constant 0 : index
      %121 = vector.load %arg10[%c3_70, %c0_71, %c0_72] : memref<8x16x4xf32, #tpu.memory_space<vmem>>, vector<1x16x4xf32>
      %122 = vector.shape_cast %121 : vector<1x16x4xf32> to vector<16x4xf32>
      %123 = vector.shape_cast %120 : vector<16x4xf32> to vector<1x16x4xf32>
      tpu.vector_store %arg10[%c3_70, %c0_71, %c0_72], %123 {strides = array<i32>} : memref<8x16x4xf32, #tpu.memory_space<vmem>>, vector<1x16x4xf32>,
      %124 = vector.extract_strided_slice %67 {offsets = [0, 16], sizes = [16, 4], strides = [1, 1]} : vector<16x96xf32> to vector<16x4xf32>
      %cst_73 = arith.constant 5.000000e-01 : f32
      %125 = vector.broadcast %cst_73 : f32 to vector<16x4xf32>
      %126 = arith.mulf %124, %125 : vector<16x4xf32>
      %c4 = arith.constant 4 : index
      %c0_74 = arith.constant 0 : index
      %c0_75 = arith.constant 0 : index
      %127 = vector.load %arg8[%c4, %c0_74, %c0_75] : memref<8x16x4xf32, #tpu.memory_space<vmem>>, vector<1x16x4xf32>
      %128 = vector.shape_cast %127 : vector<1x16x4xf32> to vector<16x4xf32>
      %129 = vector.shape_cast %126 : vector<16x4xf32> to vector<1x16x4xf32>
      tpu.vector_store %arg8[%c4, %c0_74, %c0_75], %129 {strides = array<i32>} : memref<8x16x4xf32, #tpu.memory_space<vmem>>, vector<1x16x4xf32>,
      %130 = vector.extract_strided_slice %67 {offsets = [0, 48], sizes = [16, 4], strides = [1, 1]} : vector<16x96xf32> to vector<16x4xf32>
      %c4_76 = arith.constant 4 : index
      %c0_77 = arith.constant 0 : index
      %c0_78 = arith.constant 0 : index
      %131 = vector.load %arg9[%c4_76, %c0_77, %c0_78] : memref<8x16x4xf32, #tpu.memory_space<vmem>>, vector<1x16x4xf32>
      %132 = vector.shape_cast %131 : vector<1x16x4xf32> to vector<16x4xf32>
      %133 = vector.shape_cast %130 : vector<16x4xf32> to vector<1x16x4xf32>
      tpu.vector_store %arg9[%c4_76, %c0_77, %c0_78], %133 {strides = array<i32>} : memref<8x16x4xf32, #tpu.memory_space<vmem>>, vector<1x16x4xf32>,
      %134 = vector.extract_strided_slice %67 {offsets = [0, 80], sizes = [16, 4], strides = [1, 1]} : vector<16x96xf32> to vector<16x4xf32>
      %c4_79 = arith.constant 4 : index
      %c0_80 = arith.constant 0 : index
      %c0_81 = arith.constant 0 : index
      %135 = vector.load %arg10[%c4_79, %c0_80, %c0_81] : memref<8x16x4xf32, #tpu.memory_space<vmem>>, vector<1x16x4xf32>
      %136 = vector.shape_cast %135 : vector<1x16x4xf32> to vector<16x4xf32>
      %137 = vector.shape_cast %134 : vector<16x4xf32> to vector<1x16x4xf32>
      tpu.vector_store %arg10[%c4_79, %c0_80, %c0_81], %137 {strides = array<i32>} : memref<8x16x4xf32, #tpu.memory_space<vmem>>, vector<1x16x4xf32>,
      %138 = vector.extract_strided_slice %67 {offsets = [0, 20], sizes = [16, 4], strides = [1, 1]} : vector<16x96xf32> to vector<16x4xf32>
      %cst_82 = arith.constant 5.000000e-01 : f32
      %139 = vector.broadcast %cst_82 : f32 to vector<16x4xf32>
      %140 = arith.mulf %138, %139 : vector<16x4xf32>
      %c5 = arith.constant 5 : index
      %c0_83 = arith.constant 0 : index
      %c0_84 = arith.constant 0 : index
      %141 = vector.load %arg8[%c5, %c0_83, %c0_84] : memref<8x16x4xf32, #tpu.memory_space<vmem>>, vector<1x16x4xf32>
      %142 = vector.shape_cast %141 : vector<1x16x4xf32> to vector<16x4xf32>
      %143 = vector.shape_cast %140 : vector<16x4xf32> to vector<1x16x4xf32>
      tpu.vector_store %arg8[%c5, %c0_83, %c0_84], %143 {strides = array<i32>} : memref<8x16x4xf32, #tpu.memory_space<vmem>>, vector<1x16x4xf32>,
      %144 = vector.extract_strided_slice %67 {offsets = [0, 52], sizes = [16, 4], strides = [1, 1]} : vector<16x96xf32> to vector<16x4xf32>
      %c5_85 = arith.constant 5 : index
      %c0_86 = arith.constant 0 : index
      %c0_87 = arith.constant 0 : index
      %145 = vector.load %arg9[%c5_85, %c0_86, %c0_87] : memref<8x16x4xf32, #tpu.memory_space<vmem>>, vector<1x16x4xf32>
      %146 = vector.shape_cast %145 : vector<1x16x4xf32> to vector<16x4xf32>
      %147 = vector.shape_cast %144 : vector<16x4xf32> to vector<1x16x4xf32>
      tpu.vector_store %arg9[%c5_85, %c0_86, %c0_87], %147 {strides = array<i32>} : memref<8x16x4xf32, #tpu.memory_space<vmem>>, vector<1x16x4xf32>,
      %148 = vector.extract_strided_slice %67 {offsets = [0, 84], sizes = [16, 4], strides = [1, 1]} : vector<16x96xf32> to vector<16x4xf32>
      %c5_88 = arith.constant 5 : index
      %c0_89 = arith.constant 0 : index
      %c0_90 = arith.constant 0 : index
      %149 = vector.load %arg10[%c5_88, %c0_89, %c0_90] : memref<8x16x4xf32, #tpu.memory_space<vmem>>, vector<1x16x4xf32>
      %150 = vector.shape_cast %149 : vector<1x16x4xf32> to vector<16x4xf32>
      %151 = vector.shape_cast %148 : vector<16x4xf32> to vector<1x16x4xf32>
      tpu.vector_store %arg10[%c5_88, %c0_89, %c0_90], %151 {strides = array<i32>} : memref<8x16x4xf32, #tpu.memory_space<vmem>>, vector<1x16x4xf32>,
      %152 = vector.extract_strided_slice %67 {offsets = [0, 24], sizes = [16, 4], strides = [1, 1]} : vector<16x96xf32> to vector<16x4xf32>
      %cst_91 = arith.constant 5.000000e-01 : f32
      %153 = vector.broadcast %cst_91 : f32 to vector<16x4xf32>
      %154 = arith.mulf %152, %153 : vector<16x4xf32>
      %c6 = arith.constant 6 : index
      %c0_92 = arith.constant 0 : index
      %c0_93 = arith.constant 0 : index
      %155 = vector.load %arg8[%c6, %c0_92, %c0_93] : memref<8x16x4xf32, #tpu.memory_space<vmem>>, vector<1x16x4xf32>
      %156 = vector.shape_cast %155 : vector<1x16x4xf32> to vector<16x4xf32>
      %157 = vector.shape_cast %154 : vector<16x4xf32> to vector<1x16x4xf32>
      tpu.vector_store %arg8[%c6, %c0_92, %c0_93], %157 {strides = array<i32>} : memref<8x16x4xf32, #tpu.memory_space<vmem>>, vector<1x16x4xf32>,
      %158 = vector.extract_strided_slice %67 {offsets = [0, 56], sizes = [16, 4], strides = [1, 1]} : vector<16x96xf32> to vector<16x4xf32>
      %c6_94 = arith.constant 6 : index
      %c0_95 = arith.constant 0 : index
      %c0_96 = arith.constant 0 : index
      %159 = vector.load %arg9[%c6_94, %c0_95, %c0_96] : memref<8x16x4xf32, #tpu.memory_space<vmem>>, vector<1x16x4xf32>
      %160 = vector.shape_cast %159 : vector<1x16x4xf32> to vector<16x4xf32>
      %161 = vector.shape_cast %158 : vector<16x4xf32> to vector<1x16x4xf32>
      tpu.vector_store %arg9[%c6_94, %c0_95, %c0_96], %161 {strides = array<i32>} : memref<8x16x4xf32, #tpu.memory_space<vmem>>, vector<1x16x4xf32>,
      %162 = vector.extract_strided_slice %67 {offsets = [0, 88], sizes = [16, 4], strides = [1, 1]} : vector<16x96xf32> to vector<16x4xf32>
      %c6_97 = arith.constant 6 : index
      %c0_98 = arith.constant 0 : index
      %c0_99 = arith.constant 0 : index
      %163 = vector.load %arg10[%c6_97, %c0_98, %c0_99] : memref<8x16x4xf32, #tpu.memory_space<vmem>>, vector<1x16x4xf32>
      %164 = vector.shape_cast %163 : vector<1x16x4xf32> to vector<16x4xf32>
      %165 = vector.shape_cast %162 : vector<16x4xf32> to vector<1x16x4xf32>
      tpu.vector_store %arg10[%c6_97, %c0_98, %c0_99], %165 {strides = array<i32>} : memref<8x16x4xf32, #tpu.memory_space<vmem>>, vector<1x16x4xf32>,
      %166 = vector.extract_strided_slice %67 {offsets = [0, 28], sizes = [16, 4], strides = [1, 1]} : vector<16x96xf32> to vector<16x4xf32>
      %cst_100 = arith.constant 5.000000e-01 : f32
      %167 = vector.broadcast %cst_100 : f32 to vector<16x4xf32>
      %168 = arith.mulf %166, %167 : vector<16x4xf32>
      %c7 = arith.constant 7 : index
      %c0_101 = arith.constant 0 : index
      %c0_102 = arith.constant 0 : index
      %169 = vector.load %arg8[%c7, %c0_101, %c0_102] : memref<8x16x4xf32, #tpu.memory_space<vmem>>, vector<1x16x4xf32>
      %170 = vector.shape_cast %169 : vector<1x16x4xf32> to vector<16x4xf32>
      %171 = vector.shape_cast %168 : vector<16x4xf32> to vector<1x16x4xf32>
      tpu.vector_store %arg8[%c7, %c0_101, %c0_102], %171 {strides = array<i32>} : memref<8x16x4xf32, #tpu.memory_space<vmem>>, vector<1x16x4xf32>,
      %172 = vector.extract_strided_slice %67 {offsets = [0, 60], sizes = [16, 4], strides = [1, 1]} : vector<16x96xf32> to vector<16x4xf32>
      %c7_103 = arith.constant 7 : index
      %c0_104 = arith.constant 0 : index
      %c0_105 = arith.constant 0 : index
      %173 = vector.load %arg9[%c7_103, %c0_104, %c0_105] : memref<8x16x4xf32, #tpu.memory_space<vmem>>, vector<1x16x4xf32>
      %174 = vector.shape_cast %173 : vector<1x16x4xf32> to vector<16x4xf32>
      %175 = vector.shape_cast %172 : vector<16x4xf32> to vector<1x16x4xf32>
      tpu.vector_store %arg9[%c7_103, %c0_104, %c0_105], %175 {strides = array<i32>} : memref<8x16x4xf32, #tpu.memory_space<vmem>>, vector<1x16x4xf32>,
      %176 = vector.extract_strided_slice %67 {offsets = [0, 92], sizes = [16, 4], strides = [1, 1]} : vector<16x96xf32> to vector<16x4xf32>
      %c7_106 = arith.constant 7 : index
      %c0_107 = arith.constant 0 : index
      %c0_108 = arith.constant 0 : index
      %177 = vector.load %arg10[%c7_106, %c0_107, %c0_108] : memref<8x16x4xf32, #tpu.memory_space<vmem>>, vector<1x16x4xf32>
      %178 = vector.shape_cast %177 : vector<1x16x4xf32> to vector<16x4xf32>
      %179 = vector.shape_cast %176 : vector<16x4xf32> to vector<1x16x4xf32>
      tpu.vector_store %arg10[%c7_106, %c0_107, %c0_108], %179 {strides = array<i32>} : memref<8x16x4xf32, #tpu.memory_space<vmem>>, vector<1x16x4xf32>,
      %cst_109 = arith.constant 0.000000e+00 : f32
      %180 = vector.broadcast %cst_109 : f32 to vector<16x32xf32>
      %c0_110 = arith.constant 0 : index
      %c0_111 = arith.constant 0 : index
      %181 = vector.load %arg11[%c0_110, %c0_111] : memref<16x32xf32, #tpu.memory_space<vmem>>, vector<16x32xf32>
      tpu.vector_store %arg11[%c0_110, %c0_111], %180 {strides = array<i32>} : memref<16x32xf32, #tpu.memory_space<vmem>>, vector<16x32xf32>,
    } else {
    }
    %3 = arith.index_cast %arg1 : i32 to index
    %c0 = arith.constant 0 : index
    %c0_1 = arith.constant 0 : index
    %4 = vector.load %arg8[%3, %c0, %c0_1] : memref<8x16x4xf32, #tpu.memory_space<vmem>>, vector<1x16x4xf32>
    %5 = vector.shape_cast %4 : vector<1x16x4xf32> to vector<16x4xf32>
    %6 = arith.index_cast %arg1 : i32 to index
    %c0_2 = arith.constant 0 : index
    %c0_3 = arith.constant 0 : index
    %7 = vector.load %arg9[%6, %c0_2, %c0_3] : memref<8x16x4xf32, #tpu.memory_space<vmem>>, vector<1x16x4xf32>
    %8 = vector.shape_cast %7 : vector<1x16x4xf32> to vector<16x4xf32>
    %9 = arith.index_cast %arg1 : i32 to index
    %c0_4 = arith.constant 0 : index
    %c0_5 = arith.constant 0 : index
    %10 = vector.load %arg10[%9, %c0_4, %c0_5] : memref<8x16x4xf32, #tpu.memory_space<vmem>>, vector<1x16x4xf32>
    %11 = vector.shape_cast %10 : vector<1x16x4xf32> to vector<16x4xf32>
    %12 = vector.extract_strided_slice %5 {offsets = [0, 0], sizes = [8, 4], strides = [1, 1]} : vector<16x4xf32> to vector<8x4xf32>
    %13 = vector.extract_strided_slice %8 {offsets = [0, 0], sizes = [8, 4], strides = [1, 1]} : vector<16x4xf32> to vector<8x4xf32>
    %cst = arith.constant dense<0.000000e+00> : vector<8x8xf32>
    %14 = tpu.matmul %12, %13, %cst {dimension_numbers = #tpu.dot_dimension_numbers<[1], [1], [0], [0], [0, 0, 1, 0], [], []>} : vector<8x4xf32>, vector<8x4xf32>, vector<8x8xf32> -> vector<8x8xf32>
    %cst_6 = arith.constant dense<0xFF800000> : vector<8xf32>
    %15 = vector.multi_reduction <maximumf>, %14, %cst_6 [1] : vector<8x8xf32> to vector<8xf32>
    %16 = vector.shape_cast %15 : vector<8xf32> to vector<8x1xf32>
    %17 = vector.broadcast %16 : vector<8x1xf32> to vector<8x8xf32>
    %18 = arith.subf %14, %17 : vector<8x8xf32>
    %19 = math.exp %18 : vector<8x8xf32>
    %cst_7 = arith.constant dense<0.000000e+00> : vector<8xf32>
    %20 = vector.multi_reduction <add>, %19, %cst_7 [1] : vector<8x8xf32> to vector<8xf32>
    %21 = vector.shape_cast %20 : vector<8xf32> to vector<8x1xf32>
    %22 = tpu.reciprocal %21 : vector<8x1xf32> -> vector<8x1xf32>
    %23 = vector.broadcast %22 : vector<8x1xf32> to vector<8x8xf32>
    %24 = arith.mulf %19, %23 : vector<8x8xf32>
    %c0_8 = arith.constant 0 : index
    %c0_9 = arith.constant 0 : index
    %c0_10 = arith.constant 0 : index
    %c0_11 = arith.constant 0 : index
    %25 = vector.load %arg7[%c0_8, %c0_9, %c0_10, %c0_11] : memref<2x1x8x8xf32, #tpu.memory_space<vmem>>, vector<1x1x8x8xf32>
    %26 = vector.shape_cast %25 : vector<1x1x8x8xf32> to vector<8x8xf32>
    %27 = vector.shape_cast %24 : vector<8x8xf32> to vector<1x1x8x8xf32>
    tpu.vector_store %arg7[%c0_8, %c0_9, %c0_10, %c0_11], %27 {strides = array<i32>} : memref<2x1x8x8xf32, #tpu.memory_space<vmem>>, vector<1x1x8x8xf32>,
    %28 = arith.truncf %24 : vector<8x8xf32> to vector<8x8xbf16>
    %29 = vector.extract_strided_slice %11 {offsets = [0, 0], sizes = [8, 4], strides = [1, 1]} : vector<16x4xf32> to vector<8x4xf32>
    %30 = arith.truncf %29 : vector<8x4xf32> to vector<8x4xbf16>
    %cst_12 = arith.constant dense<0.000000e+00> : vector<8x4xf32>
    %31 = tpu.matmul %28, %30, %cst_12 {dimension_numbers = #tpu.dot_dimension_numbers<[1], [0], [0], [1], [0, 0, 1, 1], [], []>} : vector<8x8xbf16>, vector<8x4xbf16>, vector<8x4xf32> -> vector<8x4xf32>
    %32 = vector.extract_strided_slice %5 {offsets = [8, 0], sizes = [8, 4], strides = [1, 1]} : vector<16x4xf32> to vector<8x4xf32>
    %33 = vector.extract_strided_slice %8 {offsets = [8, 0], sizes = [8, 4], strides = [1, 1]} : vector<16x4xf32> to vector<8x4xf32>
    %cst_13 = arith.constant dense<0.000000e+00> : vector<8x8xf32>
    %34 = tpu.matmul %32, %33, %cst_13 {dimension_numbers = #tpu.dot_dimension_numbers<[1], [1], [0], [0], [0, 0, 1, 0], [], []>} : vector<8x4xf32>, vector<8x4xf32>, vector<8x8xf32> -> vector<8x8xf32>
    %cst_14 = arith.constant dense<0xFF800000> : vector<8xf32>
    %35 = vector.multi_reduction <maximumf>, %34, %cst_14 [1] : vector<8x8xf32> to vector<8xf32>
    %36 = vector.shape_cast %35 : vector<8xf32> to vector<8x1xf32>
    %37 = vector.broadcast %36 : vector<8x1xf32> to vector<8x8xf32>
    %38 = arith.subf %34, %37 : vector<8x8xf32>
    %39 = math.exp %38 : vector<8x8xf32>
    %cst_15 = arith.constant dense<0.000000e+00> : vector<8xf32>
    %40 = vector.multi_reduction <add>, %39, %cst_15 [1] : vector<8x8xf32> to vector<8xf32>
    %41 = vector.shape_cast %40 : vector<8xf32> to vector<8x1xf32>
    %42 = tpu.reciprocal %41 : vector<8x1xf32> -> vector<8x1xf32>
    %43 = vector.broadcast %42 : vector<8x1xf32> to vector<8x8xf32>
    %44 = arith.mulf %39, %43 : vector<8x8xf32>
    %c1 = arith.constant 1 : index
    %c0_16 = arith.constant 0 : index
    %c0_17 = arith.constant 0 : index
    %c0_18 = arith.constant 0 : index
    %45 = vector.load %arg7[%c1, %c0_16, %c0_17, %c0_18] : memref<2x1x8x8xf32, #tpu.memory_space<vmem>>, vector<1x1x8x8xf32>
    %46 = vector.shape_cast %45 : vector<1x1x8x8xf32> to vector<8x8xf32>
    %47 = vector.shape_cast %44 : vector<8x8xf32> to vector<1x1x8x8xf32>
    tpu.vector_store %arg7[%c1, %c0_16, %c0_17, %c0_18], %47 {strides = array<i32>} : memref<2x1x8x8xf32, #tpu.memory_space<vmem>>, vector<1x1x8x8xf32>,
    %48 = arith.truncf %44 : vector<8x8xf32> to vector<8x8xbf16>
    %49 = vector.extract_strided_slice %11 {offsets = [8, 0], sizes = [8, 4], strides = [1, 1]} : vector<16x4xf32> to vector<8x4xf32>
    %50 = arith.truncf %49 : vector<8x4xf32> to vector<8x4xbf16>
    %cst_19 = arith.constant dense<0.000000e+00> : vector<8x4xf32>
    %51 = tpu.matmul %48, %50, %cst_19 {dimension_numbers = #tpu.dot_dimension_numbers<[1], [0], [0], [1], [0, 0, 1, 1], [], []>} : vector<8x8xbf16>, vector<8x4xbf16>, vector<8x4xf32> -> vector<8x4xf32>
    %52 = tpu.concatenate %31, %51 in 0 : vector<8x4xf32>, vector<8x4xf32> -> vector<16x4xf32>
    %c0_20 = arith.constant 0 : index
    %c0_21 = arith.constant 0 : index
    %53 = vector.load %arg11[%c0_20, %c0_21] : memref<16x32xf32, #tpu.memory_space<vmem>>, vector<16x32xf32>
    %54 = arith.truncf %52 : vector<16x4xf32> to vector<16x4xbf16>
    %c0_22 = arith.constant 0 : index
    %c0_23 = arith.constant 0 : index
    %c0_24 = arith.constant 0 : index
    %55 = vector.load %arg4[%c0_22, %c0_23, %c0_24] : memref<1x4x32xbf16, #tpu.memory_space<vmem>>, vector<1x4x32xbf16>
    %56 = vector.shape_cast %55 : vector<1x4x32xbf16> to vector<4x32xbf16>
    %cst_25 = arith.constant dense<0.000000e+00> : vector<16x32xf32>
    %57 = tpu.matmul %54, %56, %cst_25 {dimension_numbers = #tpu.dot_dimension_numbers<[1], [0], [0], [1], [0, 0, 1, 1], [], []>} : vector<16x4xbf16>, vector<4x32xbf16>, vector<16x32xf32> -> vector<16x32xf32>
    %58 = arith.addf %53, %57 : vector<16x32xf32>
    %c0_26 = arith.constant 0 : index
    %c0_27 = arith.constant 0 : index
    %59 = vector.load %arg11[%c0_26, %c0_27] : memref<16x32xf32, #tpu.memory_space<vmem>>, vector<16x32xf32>
    tpu.vector_store %arg11[%c0_26, %c0_27], %58 {strides = array<i32>} : memref<16x32xf32, #tpu.memory_space<vmem>>, vector<16x32xf32>,
    %c7_i32 = arith.constant 7 : i32
    %60 = arith.cmpi eq, %arg1, %c7_i32 : i32
    %61 = arith.extui %60 : i1 to i32
    %c0_i32_28 = arith.constant 0 : i32
    %62 = arith.cmpi ne, %61, %c0_i32_28 : i32
    scf.if %62 {
      %c0_29 = arith.constant 0 : index
      %c0_30 = arith.constant 0 : index
      %63 = vector.load %arg11[%c0_29, %c0_30] : memref<16x32xf32, #tpu.memory_space<vmem>>, vector<16x32xf32>
      %c0_31 = arith.constant 0 : index
      %c0_32 = arith.constant 0 : index
      %64 = vector.load %arg5[%c0_31, %c0_32] : memref<1x32xf32, #tpu.memory_space<vmem>>, vector<1x32xf32>
      %65 = vector.broadcast %64 : vector<1x32xf32> to vector<16x32xf32>
      %66 = arith.addf %63, %65 : vector<16x32xf32>
      %67 = vector.shape_cast %66 : vector<16x32xf32> to vector<2x8x32xf32>
      %c0_33 = arith.constant 0 : index
      %c0_34 = arith.constant 0 : index
      %c0_35 = arith.constant 0 : index
      %68 = vector.load %arg6[%c0_33, %c0_34, %c0_35] : memref<2x8x32xf32, #tpu.memory_space<vmem>>, vector<2x8x32xf32>
      tpu.vector_store %arg6[%c0_33, %c0_34, %c0_35], %67 {strides = array<i32>} : memref<2x8x32xf32, #tpu.memory_space<vmem>>, vector<2x8x32xf32>,
    } else {
    }
    return
  }
  func.func @transform_0(%arg0: i32, %arg1: i32) -> (i32, i32, i32) {
    %c0_i32 = arith.constant 0 : i32
    %c0_i32_0 = arith.constant 0 : i32
    %c0_i32_1 = arith.constant 0 : i32
    return %arg0, %c0_i32, %c0_i32_0 : i32, i32, i32
  }
  func.func @transform_1(%arg0: i32, %arg1: i32) -> (i32, i32) {
    %c0_i32 = arith.constant 0 : i32
    %c0_i32_0 = arith.constant 0 : i32
    %c0_i32_1 = arith.constant 0 : i32
    return %c0_i32, %c0_i32_0 : i32, i32
  }
  func.func @transform_2(%arg0: i32, %arg1: i32) -> (i32, i32, i32) {
    %c0_i32 = arith.constant 0 : i32
    %c0_i32_0 = arith.constant 0 : i32
    %c0_i32_1 = arith.constant 0 : i32
    return %arg1, %c0_i32, %c0_i32_0 : i32, i32, i32
  }
  func.func @transform_3(%arg0: i32, %arg1: i32) -> (i32, i32) {
    %c0_i32 = arith.constant 0 : i32
    %c0_i32_0 = arith.constant 0 : i32
    %c0_i32_1 = arith.constant 0 : i32
    return %c0_i32, %c0_i32_0 : i32, i32
  }
  func.func @transform_4(%arg0: i32, %arg1: i32) -> (i32, i32, i32) {
    %c0_i32 = arith.constant 0 : i32
    %c0_i32_0 = arith.constant 0 : i32
    %c0_i32_1 = arith.constant 0 : i32
    return %arg0, %c0_i32, %c0_i32_0 : i32, i32, i32
  }
  func.func @transform_5(%arg0: i32, %arg1: i32) -> (i32, i32, i32, i32) {
    %c0_i32 = arith.constant 0 : i32
    %c0_i32_0 = arith.constant 0 : i32
    %c0_i32_1 = arith.constant 0 : i32
    return %arg0, %arg1, %c0_i32, %c0_i32_0 : i32, i32, i32, i32
  }
}

</mosaic_0001>

<bundles_post_ra>
// kernel: tpu_custom_call.1
= control target key start
LH: loop header
LB: loop body
LE: loop exit
PB: predicated region body
PF: predicated region fallthrough
CT: control target
= control target key end

     0   :  { %s1933_s0 = inlined_call_operand.hbm [shape: f32[2,8,32], index: 0, kind: input, shape index: {}]   ;;  %s1934_s1 = inlined_call_operand.hbm [shape: bf16[32,96], index: 1, kind: input, shape index: {}]   ;;  %s1935_s2 = inlined_call_operand.hbm [shape: bf16[8,4,32], index: 2, kind: input, shape index: {}]   ;;  %s1936_s3 = inlined_call_operand.vmem [shape: f32[1,32], index: 3, kind: input, shape index: {}]   ;;  %s1937_s4 = inlined_call_operand.hbm [shape: f32[2,8,32], index: 4, kind: output, shape index: {0}]   ;;  %s1938_s5 = inlined_call_operand.hbm [shape: f32[2,8,8,8], index: 5, kind: output, shape index: {1}]  }
   0x1   :  { %1940 = sst [smem:[#allocation20_spill]] %s1933_s0 }
   0x2   :  { %11 = vsyncpa [#allocation7], 0 }
   0x3   :  { %12 = vsyncpa [#allocation10], 0 }
   0x4   :  { %13 = vsyncpa [#allocation8], 0 }
   0x5   :  { %14 = vsyncpa [#allocation14], 0 }
   0x6   :  { %16 = vsyncpa [#allocation14 + $0x1], 0  ;;  %s1582_s18 = smov 0   ;;  %s1584_s19 = smov 0  }
   0x7   :  { %s1586_s20 = smov 0   ;;  %s1588_s21 = smov 0  }
   0x8   :  { %s1590_s22 = smov 0   ;;  %s1592_s23 = smov 0  }
   0x9 LB: > { %s1613_s24 = sadd.s32 4294967295, %s1511_s23   ;;  %s1099_s25 = sadd.s32 4294967294, %s1511_s23   ;;  %s1511_s23 = sphi %s1592_s23, %s22_s23   ;;  %s1507_s22 = sphi %s1590_s22, %s1962_s22   ;;  %s1503_s21 = sphi %s1588_s21, %s1961_s21   ;;  %s1499_s20 = sphi %s1586_s20, %s1960_s20   ;;  %s1495_s19 = sphi %s1584_s19, %s1959_s19   ;;  %s1491_s18 = sphi %s1582_s18, %s1958_s18  }
   0xa   : > { %p101_p0 = scmp.ne.s32.totalorder %s1495_s19, %s1491_s18  ;;  %p1939_p1 = scmp.eq.s32.totalorder %s1613_s24, 0 }
   0xb   : > { %p180_p3 = scmp.eq.s32.totalorder %s1099_s25, 7  ;;  %p1100_p5 = scmp.ge.s32.totalorder %s1511_s23, 1 }
   0xc   : > { %p1622_p4 = por %p1939_p1, %p101_p0  ;;  %p187_p7 = scmp.lt.s32.totalorder %s1511_s23, 9 }
   0xd   : > { %p1627_p6 = por %p180_p3, %p101_p0  ;;  %s1513_s29 = smov [#allocation6]  }
   0xe   : > { %p1632_p8 = pnand %p1100_p5, %p187_p7  ;;  %s202_s30 = sshll.u32 %s1513_s29, 4  ;;  %s203_s30 = int_to_ptr.vmem [resolvable:$true] %s202_s30 }
   0xf   : > { %s1942_s27 = scalar_select %p1627_p6, 1, 0 }
  0x10   : > { %p1197_p9 = pneg %p1632_p8  ;;  %s1514_s7 = smov [#allocation9]  }
  0x11   : > { %s215_s8 = sshll.u32 %s1514_s7, 4  ;;  %s1326_s9 = scalar_lea.vmem %s203_s30, 256  ;;  %s216_s8 = int_to_ptr.vmem [resolvable:$true] %s215_s8 }
  0x12   : > { %p1640_p10 = pnand %p1197_p9, %p1939_p1  ;;  %p1327_p12 = scmp.ne.s32.totalorder %s203_s30, %s1326_s9 }
  0x13   : > { %p1334_p3 = scmp.lt.s32.totalorder %s203_s30, %s203_s30  ;;  %p1335_p5 = scmp.lt.s32.totalorder %s1326_s9, %s1326_s9 }
  0x14   : > { %p1317_p11 = pneg %p1640_p10 }
  0x15   : > { %p1336_p7 = por %p1335_p5, %p1334_p3 }
  0x16   : > { %p1329_p13 = pnand %p1327_p12, %p1317_p11 }
  0x18   : > { %p1330_p0 = pneg %p1329_p13 }
  0x1a   : > { %p1337_p9 = pnand %p1336_p7, %p1330_p0 }
  0x1c   : > { %1340 = shalt.err (!%p1337_p9)
}
  0x1d   : > { %s1515_s10 = smov 128   ;;  %s1516_s11 = smov 8  }
  0x1e   : > { %s1945_s0 = sld [smem:[#allocation20_spill]]  ;;  %s1352_s14 = scalar_lea.vmem %s216_s8, 256 }
  0x1f   : > { %p1353_p1 = scmp.ne.s32.totalorder %s216_s8, %s1352_s14  ;;  %p1360_p2 = scmp.lt.s32.totalorder %s216_s8, %s216_s8 }
  0x20   : > { %p1361_p6 = scmp.lt.s32.totalorder %s1352_s14, %s1352_s14 }
  0x21   : > { %p1355_p12 = pnand %p1353_p1, %p1317_p11 }
  0x22   : > { %p1362_p3 = por %p1361_p6, %p1360_p2 }
  0x23   : > { %p1356_p13 = pneg %p1355_p12 }
  0x24   : > { %1200 = dma.hbm_to_vmem [thread:$0]  (!%p1640_p10), %s1945_s0, 256, %s203_s30, [#allocation7], %s1515_s10, %s1515_s10, %s1516_s11  }
  0x25   : > { %p1363_p0 = pnand %p1362_p3, %p1356_p13 }
  0x27   : > { %1366 = shalt.err (!%p1363_p0)
}
  0x28   : > { %s1517_s15 = smov 64   ;;  %s1518_s16 = smov 4  }
  0x29   : > { %1203 = dma.hbm_to_vmem [thread:$0]  (!%p1640_p10), %s1934_s1, 256, %s216_s8, [#allocation10], %s1517_s15, %s1517_s15, %s1518_s16  }
  0x2a   : > { %s31_s29 = sadd.s32 1, %s1507_s22  ;;  %s88_s30 = sadd.s32 1, %s1499_s20 }
  0x2b   : > { %p32_p1 = scmp.ge.s32.totalorder %s31_s29, 8  ;;  %p95_p2 = scmp.ne.s32.totalorder %s1499_s20, %s1495_s19 }
  0x2c   : > { %p96_p6 = scmp.eq.s32.totalorder %s1511_s23, 0  ;;  %p1214_p11 = scmp.lt.s32.totalorder %s1511_s23, 8 }
  0x2d   : > { %s1964_s29 = smov (%p32_p1, %s31_s29), 0  ;;  %p1946_p7 = scmp.eq.s32.totalorder %s1613_s24, 7 }
  0x2e   : > { %p97_p5 = por %p96_p6, %p95_p2  ;;  %s85_s6 = ssub.s32 %s1507_s22, %s1964_s29 }
  0x2f   : > { %p1672_p9 = por %p1946_p7, %p95_p2  ;;  %s232_s9 = sand.u32 1, %s1511_s23  }
  0x30   : > { %p86_p12 = scmp.eq.s32.totalorder %s85_s6, 0  ;;  %s234_s10 = sand.u32 1, %s1499_s20  }
  0x31   : > { %s1105_s8 = sshll.u32 %s1507_s22, 5  ;;  %s1104_s12 = sshll.u32 %s234_s10, 1 }
  0x32   : > { %s1682_s11 = scalar_select %p86_p12, %s1499_s20, %s88_s30  }
  0x33   : > { %s241_s15 = scalar_lea.hbm %s1935_s2, %s1105_s8  ;;  %p1687_p10 = pnand %p1214_p11, %p97_p5 }
  0x34   : > { %s236_s17 = scalar_lea.vmem [#allocation11], %s1104_s12  ;;  %s233_s0 = scalar_lea.sflag [#allocation7], %s232_s9 }
  0x35   : > { %s243_s25 = sshll.u32 %s236_s17, 4  ;;  %p1369_p13 = pneg %p1687_p10  ;;  %s244_s25 = int_to_ptr.vmem [resolvable:$true] %s243_s25 }
  0x36   : > { %s1380_s6 = scalar_lea.vmem %s244_s25, 32  ;;  %s1519_s30 = smov [#allocation11]  }
  0x37   : > { %p1381_p3 = scmp.ne.s32.totalorder %s244_s25, %s1380_s6  ;;  %s1385_s10 = sshll.u32 %s1519_s30, 4  ;;  %s1386_s10 = int_to_ptr.vmem [resolvable:$false] %s1385_s10 }
  0x38   : > { %s1387_s13 = scalar_lea.vmem %s1386_s10, 64  ;;  %p1388_p2 = scmp.lt.s32.totalorder %s244_s25, %s1386_s10 }
  0x39   : > { %p1383_p0 = pnand %p1381_p3, %p1369_p13  ;;  %p1389_p6 = scmp.lt.s32.totalorder %s1387_s13, %s1380_s6 }
  0x3b   : > { %p1384_p1 = pneg %p1383_p0  ;;  %p1390_p11 = por %p1389_p6, %p1388_p2 }
  0x3d   : > { %p1391_p5 = pnand %p1390_p11, %p1384_p1 }
  0x3f   : > { %1394 = shalt.err (!%p1391_p5)
}
  0x40   : > { %1207 = dma.hbm_to_vmem [thread:$0]  (!%p1687_p10), %s241_s15, 32, %s244_s25, %s233_s0  }
  0x41   : > { %252 = sbr.rel (%p1632_p8) target bundleno = 1455 (0x5af), region = 36  ;;  %p1949_p7 = scmp.eq.s32.totalorder (!%p1632_p8), %s1613_s24, 0 }
  0x46   : > { %1470 = dma.done.wait (%p1949_p7), [#allocation7], 256   ;;  %p1950_p12 = pmov %p1949_p7 }
  0x47   : > { %p1951_p13 = pmov %p1949_p7 }
  0x48   : > { %1472 = vsyncadd (%p1950_p12), [#allocation7], 4294967040 }
  0x49   : > { %1474 = dma.done.wait (%p1951_p13), [#allocation10], 256   ;;  %p1952_p3 = pmov %p1949_p7 }
  0x4a   : > { %s262_s9 = sand.u32 1, %s1613_s24   ;;  %s1707_s0 = sand.u32 1, %s1495_s19  }
  0x4b   : > { %1476 = vsyncadd (%p1952_p3), [#allocation10], 4294967040  ;;  %s1109_s28 = sshll.u32 %s1707_s0, 1  ;;  %s263_s8 = scalar_lea.sflag [#allocation7], %s262_s9 }
  0x4c   : > { %s1710_s12 = scalar_lea.vmem [#allocation11], %s1109_s28 }
  0x4d   : > { %1478 = dma.done.wait (%p1622_p4), %s263_s8, 32  }
  0x4e   : > { %1480 = vsyncadd (%p1622_p4), %s263_s8, 4294967264  ;;  %s1110_s14 = sshll.u32 %s1707_s0, 4  ;;  %p1111_p8 = scmp.ne.s32.totalorder %s1503_s21, 0 }
  0x4f   : > { %s1717_s15 = scalar_lea.vmem [#allocation13], %s1110_s14  ;;  %s1522_s26 = smov (!%p1111_p8), 64  }
  0x50   : > { %300 = sbr.rel (%p1111_p8) target bundleno = 491 (0x1eb), region = 52  ;;  %s1523_s16 = smov (!%p1111_p8), 96  }
  0x51   : > { %s1524_s17 = smov (!%p1111_p8), 92   ;;  %s1525_s25 = smov (!%p1111_p8), 60  }
  0x52   : > { %s1526_s6 = smov (!%p1111_p8), 88   ;;  %s1527_s30 = smov (!%p1111_p8), 56  }
  0x53   : > { %s1528_s10 = smov (!%p1111_p8), 84   ;;  %s1529_s13 = smov (!%p1111_p8), 52  }
  0x54   : > { %s1530_s9 = smov (!%p1111_p8), 80   ;;  %s1531_s28 = smov (!%p1111_p8), 48  }
  0x55   : > { %v1305_v0 = vld [vmem:[#allocation9 + $0x8] sm:$0xff]   ;;  %v1520_v1 = vmov 0.0   ;;  %v1306_v2 = vld [vmem:[#allocation9] sm:$0xff]   ;;  %vm1521_vm0 = vmmov 0   ;;  %v301_v3 = vld [vmem:[#allocation6] sm:$0xff]  ;;  %vm320_vm1 = vcmask 261120  }
  0x56   : > { %1145 = vmatprep.subr.bf16.mxu0 %v1520_v1  ;;  %1149 = vmatprep.mubr.msk.bf16.mxu0 %vm1521_vm0, %v1520_v1  ;;  %v302_v4 = vld [vmem:[#allocation6 + $0x8] sm:$0xff]  ;;  %579 = vst.msk [vmem:[#allocation5] sm:$0xff] %vm320_vm1, %v1520_v1  ;;  %580 = vst.msk [vmem:[#allocation5 + $0x8] sm:$0xff] %vm320_vm1, %v1520_v1  ;;  %vm367_vm2 = vcmask 31744   ;;  %s1532_s8 = smov 76   ;;  %s1533_s14 = smov 44  }
  0x57   : > { %1146 = vmatpush3.bf16.msra.mxu0 %v1305_v0  ;;  %v303_v5 = vpack.c.bf16 %v302_v4, %v301_v3 }
  0x58   : > { %1147 = vmatprep.subr.bf16.mxu0 %v1520_v1 }
  0x5b   : > { %1148 = vmatpush3.bf16.msra.mxu0 %v1306_v2 }
  0x5e   : > { %1150 = vmatmul.mubr.msk.bf16.vlgmr.msra.gmra.mxu0 %vm320_vm1, %v303_v5 }
 0x11e   : > { %v1720_v6 = vpop.f32.mrf.mxu0 }
 0x11f   : > { %380 = vrot.lane.b32.xlu1 %v1720_v6, %s1522_s26  ;;  %372 = vrot.lane.b32.xlu0 %v1720_v6, %s1523_s16  ;;  %v1726_v7 = vmul.f32 0.5, %v1720_v6 }
 0x120   : > { %v1151_v8 = vpop.f32.mrf.mxu0 }
 0x121   : > { %368 = vst.msk [vmem:[#allocation2] sm:$0xff] %vm367_vm2, %v1726_v7 }
 0x122   : > { %v1730_v9 = vpop.f32.mrf.mxu0 }
 0x123   : > { %399 = vrot.lane.b32.xlu0 %v1720_v6, %s1524_s17  ;;  %382 = vrot.lane.b32.xlu1 %v1730_v9, %s1522_s26  ;;  %v366_v10 = vmul.f32 0.5, %v1730_v9  ;;  %s1534_s26 = smov 72  }
 0x124   : > { %v1152_v11 = vpop.f32.mrf.mxu0 }
 0x125   : > { %369 = vst.msk [vmem:[#allocation2 + $0x8] sm:$0xff] %vm367_vm2, %v366_v10 }
 0x127   : > { %408 = vrot.lane.b32.xlu0 %v1720_v6, %s1525_s25  ;;  %401 = vrot.lane.b32.xlu1 %v1730_v9, %s1524_s17  ;;  %s1535_s17 = smov 40  }
 0x12b   : > { %426 = vrot.lane.b32.xlu0 %v1720_v6, %s1526_s6  ;;  %410 = vrot.lane.b32.xlu1 %v1730_v9, %s1525_s25  ;;  %s1536_s25 = smov 68  }
 0x12f   : > { %435 = vrot.lane.b32.xlu0 %v1720_v6, %s1527_s30  ;;  %428 = vrot.lane.b32.xlu1 %v1730_v9, %s1526_s6  ;;  %s1537_s6 = smov 124  }
 0x133   : > { %453 = vrot.lane.b32.xlu0 %v1720_v6, %s1528_s10  ;;  %437 = vrot.lane.b32.xlu1 %v1730_v9, %s1527_s30  ;;  %s1538_s30 = smov 120  }
 0x137   : > { %462 = vrot.lane.b32.xlu0 %v1720_v6, %s1529_s13  ;;  %455 = vrot.lane.b32.xlu1 %v1730_v9, %s1528_s10  ;;  %s1539_s10 = smov 116  }
 0x13b   : > { %480 = vrot.lane.b32.xlu0 %v1720_v6, %s1530_s9  ;;  %464 = vrot.lane.b32.xlu1 %v1730_v9, %s1529_s13  ;;  %s1540_s13 = smov 112  }
 0x13f   : > { %489 = vrot.lane.b32.xlu0 %v1720_v6, %s1531_s28  ;;  %482 = vrot.lane.b32.xlu1 %v1730_v9, %s1530_s9  ;;  %s1541_s9 = smov 108  }
 0x143   : > { %507 = vrot.lane.b32.xlu0 %v1720_v6, %s1532_s8  ;;  %491 = vrot.lane.b32.xlu1 %v1730_v9, %s1531_s28  ;;  %s1542_s28 = smov 104  }
 0x147   : > { %516 = vrot.lane.b32.xlu0 %v1720_v6, %s1533_s14  ;;  %509 = vrot.lane.b32.xlu1 %v1730_v9, %s1532_s8  ;;  %s1543_s8 = smov 100  }
 0x14b   : > { %534 = vrot.lane.b32.xlu0 %v1720_v6, %s1534_s26  ;;  %518 = vrot.lane.b32.xlu1 %v1730_v9, %s1533_s14  ;;  %s1544_s14 = smov 36  }
 0x14f   : > { %543 = vrot.lane.b32.xlu0 %v1720_v6, %s1535_s17  ;;  %536 = vrot.lane.b32.xlu1 %v1730_v9, %s1534_s26 }
 0x153   : > { %561 = vrot.lane.b32.xlu0 %v1720_v6, %s1536_s25  ;;  %545 = vrot.lane.b32.xlu1 %v1730_v9, %s1535_s17 }
 0x157   : > { %390 = vrot.lane.b32.xlu0 %v1726_v7, %s1537_s6  ;;  %563 = vrot.lane.b32.xlu1 %v1730_v9, %s1536_s25 }
 0x15b   : > { %417 = vrot.lane.b32.xlu0 %v1726_v7, %s1538_s30  ;;  %392 = vrot.lane.b32.xlu1 %v366_v10, %s1537_s6 }
 0x15f   : > { %444 = vrot.lane.b32.xlu0 %v1726_v7, %s1539_s10  ;;  %419 = vrot.lane.b32.xlu1 %v366_v10, %s1538_s30 }
 0x163   : > { %471 = vrot.lane.b32.xlu0 %v1726_v7, %s1540_s13  ;;  %446 = vrot.lane.b32.xlu1 %v366_v10, %s1539_s10 }
 0x167   : > { %498 = vrot.lane.b32.xlu0 %v1726_v7, %s1541_s9  ;;  %473 = vrot.lane.b32.xlu1 %v366_v10, %s1540_s13 }
 0x16b   : > { %525 = vrot.lane.b32.xlu0 %v1726_v7, %s1542_s28  ;;  %500 = vrot.lane.b32.xlu1 %v366_v10, %s1541_s9 }
 0x16f   : > { %552 = vrot.lane.b32.xlu0 %v1726_v7, %s1543_s8  ;;  %527 = vrot.lane.b32.xlu1 %v366_v10, %s1542_s28 }
 0x173   : > { %374 = vrot.lane.b32.xlu0 %v1730_v9, %s1523_s16  ;;  %554 = vrot.lane.b32.xlu1 %v366_v10, %s1543_s8 }
 0x177   : > { %570 = vrot.lane.b32.xlu0 %v1720_v6, %s1544_s14  ;;  %572 = vrot.lane.b32.xlu1 %v1730_v9, %s1544_s14 }
 0x191   : > { %v381_v12 = vpop.permute.xlu1 %380  ;;  %v373_v13 = vpop.permute.xlu0 %372 }
 0x192   : > { %386 = vst.msk [vmem:[#allocation4] sm:$0xff] %vm367_vm2, %v381_v12  ;;  %378 = vst.msk [vmem:[#allocation3] sm:$0xff] %vm367_vm2, %v373_v13 }
 0x195   : > { %v400_v14 = vpop.permute.xlu0 %399  ;;  %v383_v15 = vpop.permute.xlu1 %382 }
 0x196   : > { %406 = vst.msk [vmem:[#allocation3 + $0x10] sm:$0xff] %vm367_vm2, %v400_v14  ;;  %387 = vst.msk [vmem:[#allocation4 + $0x8] sm:$0xff] %vm367_vm2, %v383_v15 }
 0x199   : > { %v409_v16 = vpop.permute.xlu0 %408  ;;  %v402_v17 = vpop.permute.xlu1 %401 }
 0x19a   : > { %415 = vst.msk [vmem:[#allocation4 + $0x10] sm:$0xff] %vm367_vm2, %v409_v16  ;;  %407 = vst.msk [vmem:[#allocation3 + $0x18] sm:$0xff] %vm367_vm2, %v402_v17 }
 0x19d   : > { %v427_v18 = vpop.permute.xlu0 %426  ;;  %v411_v19 = vpop.permute.xlu1 %410 }
 0x19e   : > { %433 = vst.msk [vmem:[#allocation3 + $0x20] sm:$0xff] %vm367_vm2, %v427_v18  ;;  %416 = vst.msk [vmem:[#allocation4 + $0x18] sm:$0xff] %vm367_vm2, %v411_v19 }
 0x1a1   : > { %v436_v20 = vpop.permute.xlu0 %435  ;;  %v429_v21 = vpop.permute.xlu1 %428 }
 0x1a2   : > { %442 = vst.msk [vmem:[#allocation4 + $0x20] sm:$0xff] %vm367_vm2, %v436_v20  ;;  %434 = vst.msk [vmem:[#allocation3 + $0x28] sm:$0xff] %vm367_vm2, %v429_v21 }
 0x1a5   : > { %v454_v22 = vpop.permute.xlu0 %453  ;;  %v438_v23 = vpop.permute.xlu1 %437 }
 0x1a6   : > { %460 = vst.msk [vmem:[#allocation3 + $0x30] sm:$0xff] %vm367_vm2, %v454_v22  ;;  %443 = vst.msk [vmem:[#allocation4 + $0x28] sm:$0xff] %vm367_vm2, %v438_v23 }
 0x1a9   : > { %v463_v24 = vpop.permute.xlu0 %462  ;;  %v456_v25 = vpop.permute.xlu1 %455 }
 0x1aa   : > { %469 = vst.msk [vmem:[#allocation4 + $0x30] sm:$0xff] %vm367_vm2, %v463_v24  ;;  %461 = vst.msk [vmem:[#allocation3 + $0x38] sm:$0xff] %vm367_vm2, %v456_v25 }
 0x1ad   : > { %v481_v26 = vpop.permute.xlu0 %480  ;;  %v465_v27 = vpop.permute.xlu1 %464 }
 0x1ae   : > { %487 = vst.msk [vmem:[#allocation3 + $0x40] sm:$0xff] %vm367_vm2, %v481_v26  ;;  %470 = vst.msk [vmem:[#allocation4 + $0x38] sm:$0xff] %vm367_vm2, %v465_v27 }
 0x1b1   : > { %v490_v28 = vpop.permute.xlu0 %489  ;;  %v483_v29 = vpop.permute.xlu1 %482 }
 0x1b2   : > { %496 = vst.msk [vmem:[#allocation4 + $0x40] sm:$0xff] %vm367_vm2, %v490_v28  ;;  %488 = vst.msk [vmem:[#allocation3 + $0x48] sm:$0xff] %vm367_vm2, %v483_v29 }
 0x1b5   : > { %v508_v30 = vpop.permute.xlu0 %507  ;;  %v492_v31 = vpop.permute.xlu1 %491 }
 0x1b6   : > { %514 = vst.msk [vmem:[#allocation3 + $0x50] sm:$0xff] %vm367_vm2, %v508_v30  ;;  %497 = vst.msk [vmem:[#allocation4 + $0x48] sm:$0xff] %vm367_vm2, %v492_v31 }
 0x1b9   : > { %v517_v32 = vpop.permute.xlu0 %516  ;;  %v510_v33 = vpop.permute.xlu1 %509 }
 0x1ba   : > { %523 = vst.msk [vmem:[#allocation4 + $0x50] sm:$0xff] %vm367_vm2, %v517_v32  ;;  %515 = vst.msk [vmem:[#allocation3 + $0x58] sm:$0xff] %vm367_vm2, %v510_v33 }
 0x1bd   : > { %v535_v34 = vpop.permute.xlu0 %534  ;;  %v519_v35 = vpop.permute.xlu1 %518 }
 0x1be   : > { %541 = vst.msk [vmem:[#allocation3 + $0x60] sm:$0xff] %vm367_vm2, %v535_v34  ;;  %524 = vst.msk [vmem:[#allocation4 + $0x58] sm:$0xff] %vm367_vm2, %v519_v35 }
 0x1c1   : > { %v544_v36 = vpop.permute.xlu0 %543  ;;  %v537_v37 = vpop.permute.xlu1 %536 }
 0x1c2   : > { %550 = vst.msk [vmem:[#allocation4 + $0x60] sm:$0xff] %vm367_vm2, %v544_v36  ;;  %542 = vst.msk [vmem:[#allocation3 + $0x68] sm:$0xff] %vm367_vm2, %v537_v37 }
 0x1c5   : > { %v562_v38 = vpop.permute.xlu0 %561  ;;  %v546_v39 = vpop.permute.xlu1 %545 }
 0x1c6   : > { %568 = vst.msk [vmem:[#allocation3 + $0x70] sm:$0xff] %vm367_vm2, %v562_v38  ;;  %551 = vst.msk [vmem:[#allocation4 + $0x68] sm:$0xff] %vm367_vm2, %v546_v39 }
 0x1c9   : > { %v391_v40 = vpop.permute.xlu0 %390  ;;  %v564_v41 = vpop.permute.xlu1 %563 }
 0x1ca   : > { %397 = vst.msk [vmem:[#allocation2 + $0x10] sm:$0xff] %vm367_vm2, %v391_v40  ;;  %569 = vst.msk [vmem:[#allocation3 + $0x78] sm:$0xff] %vm367_vm2, %v564_v41 }
 0x1cd   : > { %v418_v42 = vpop.permute.xlu0 %417  ;;  %v393_v43 = vpop.permute.xlu1 %392 }
 0x1ce   : > { %424 = vst.msk [vmem:[#allocation2 + $0x20] sm:$0xff] %vm367_vm2, %v418_v42  ;;  %398 = vst.msk [vmem:[#allocation2 + $0x18] sm:$0xff] %vm367_vm2, %v393_v43 }
 0x1d1   : > { %v445_v44 = vpop.permute.xlu0 %444  ;;  %v420_v45 = vpop.permute.xlu1 %419 }
 0x1d2   : > { %451 = vst.msk [vmem:[#allocation2 + $0x30] sm:$0xff] %vm367_vm2, %v445_v44  ;;  %425 = vst.msk [vmem:[#allocation2 + $0x28] sm:$0xff] %vm367_vm2, %v420_v45 }
 0x1d5   : > { %v472_v46 = vpop.permute.xlu0 %471  ;;  %v447_v47 = vpop.permute.xlu1 %446 }
 0x1d6   : > { %478 = vst.msk [vmem:[#allocation2 + $0x40] sm:$0xff] %vm367_vm2, %v472_v46  ;;  %452 = vst.msk [vmem:[#allocation2 + $0x38] sm:$0xff] %vm367_vm2, %v447_v47 }
 0x1d9   : > { %v499_v48 = vpop.permute.xlu0 %498  ;;  %v474_v49 = vpop.permute.xlu1 %473 }
 0x1da   : > { %505 = vst.msk [vmem:[#allocation2 + $0x50] sm:$0xff] %vm367_vm2, %v499_v48  ;;  %479 = vst.msk [vmem:[#allocation2 + $0x48] sm:$0xff] %vm367_vm2, %v474_v49 }
 0x1dd   : > { %v526_v50 = vpop.permute.xlu0 %525  ;;  %v501_v51 = vpop.permute.xlu1 %500 }
 0x1de   : > { %532 = vst.msk [vmem:[#allocation2 + $0x60] sm:$0xff] %vm367_vm2, %v526_v50  ;;  %506 = vst.msk [vmem:[#allocation2 + $0x58] sm:$0xff] %vm367_vm2, %v501_v51 }
 0x1e1   : > { %v553_v52 = vpop.permute.xlu0 %552  ;;  %v528_v53 = vpop.permute.xlu1 %527 }
 0x1e2   : > { %559 = vst.msk [vmem:[#allocation2 + $0x70] sm:$0xff] %vm367_vm2, %v553_v52  ;;  %533 = vst.msk [vmem:[#allocation2 + $0x68] sm:$0xff] %vm367_vm2, %v528_v53 }
 0x1e5   : > { %v375_v54 = vpop.permute.xlu0 %374  ;;  %v555_v55 = vpop.permute.xlu1 %554 }
 0x1e6   : > { %379 = vst.msk [vmem:[#allocation3 + $0x8] sm:$0xff] %vm367_vm2, %v375_v54  ;;  %560 = vst.msk [vmem:[#allocation2 + $0x78] sm:$0xff] %vm367_vm2, %v555_v55 }
 0x1e9   : > { %v571_v56 = vpop.permute.xlu0 %570  ;;  %v573_v57 = vpop.permute.xlu1 %572 }
 0x1ea   : > { %577 = vst.msk [vmem:[#allocation4 + $0x70] sm:$0xff] %vm367_vm2, %v571_v56  ;;  %578 = vst.msk [vmem:[#allocation4 + $0x78] sm:$0xff] %vm367_vm2, %v573_v57 }
 0x1eb PF: > { %s1819_s16 = sshll.u32 %s1503_s21, 4  ;;  %vm591_vm3 = vcmask 31744   ;;  %v1545_v58 = vmov 0.0   ;;  %vm1546_vm4 = vmmov 0   ;;  %vm668_vm5 = vcmask 64512   ;;  %v867_v40 = vld [vmem:[#allocation5] sm:$0xff] }
 0x1ec   : > { %1153 = vmatprep.subr.mxu0 %v1545_v58  ;;  %1155 = vmatprep.mubr.msk.f32.mxu0 %vm1546_vm4, %v1545_v58  ;;  %s585_s26 = scalar_lea.vmem [#allocation3], %s1819_s16  ;;  %s582_s17 = scalar_lea.vmem [#allocation2], %s1819_s16  ;;  %vm686_vm6 = vcmask 1043456   ;;  %v870_v29 = vld [vmem:[%s1710_s12] sm:$0x3]  ;;  %vm874_vm7 = vcmask 1041408  }
 0x1ed   : > { %v586_v59 = vld [vmem:[%s585_s26] sm:$0xff]  ;;  %1158 = vmatprep.subr.bf16.mxu1 %v1545_v58  ;;  %1160 = vmatprep.mubr.msk.bf16.mxu1 %vm1546_vm4, %v1545_v58  ;;  %v587_v61 = vld [vmem:[%s585_s26 + $0x8] sm:$0xff]  ;;  %s588_s25 = scalar_lea.vmem [#allocation4], %s1819_s16  ;;  %v876_v30 = vsel %vm874_vm7, %v870_v29, 0  ;;  %vm921_vm8 = vcmask 261120   ;;  %p1124_p4 = scmp.ne.s32.totalorder %s1503_s21, 7 }
 0x1ee   : > { %1154 = vmatpush3.xpose.msk.msra.mxu0 %vm591_vm3, %v586_v59  ;;  %v583_v60 = vld [vmem:[%s582_s17] sm:$0xff]  ;;  %v584_v62 = vld [vmem:[%s582_s17 + $0x8] sm:$0xff] }
 0x1ef   : > { %1164 = vmatprep.subr.mxu0 %v1545_v58  ;;  %v868_v44 = vld [vmem:[#allocation5 + $0x8] sm:$0xff] }
 0x1f1   : > { %1156 = vmatmul.mubr.msk.f32.vlgmr.msra.gmra.mxu0 %vm591_vm3, %v583_v60  ;;  %v589_v15 = vld [vmem:[%s588_s25] sm:$0xff]  ;;  %v590_v18 = vld [vmem:[%s588_s25 + $0x8] sm:$0xff] }
 0x1f2   : > { %1165 = vmatpush3.xpose.msk.msra.mxu0 %vm591_vm3, %v587_v61  ;;  %1166 = vmatprep.mubr.msk.f32.mxu0 %vm1546_vm4, %v1545_v58  ;;  %v682_v16 = vpack.c.bf16 %v589_v15, %v589_v15  ;;  %v820_v19 = vpack.c.bf16 %v590_v18, %v590_v18 }
 0x1f3   : > { %1169 = vmatprep.subr.bf16.mxu0 %v1545_v58 }
 0x1f4   : > { %v688_v17 = vsel %vm686_vm6, %v682_v16, 0  ;;  %v825_v20 = vsel %vm686_vm6, %v820_v19, 0 }
 0x1f5   : > { %1167 = vmatmul.mubr.msk.f32.vlgmr.msra.gmra.mxu0 %vm591_vm3, %v584_v62  ;;  %1159 = vmatpush3.bf16.msra.mxu1 %v688_v17 }
 0x1f6   : > { %1171 = vmatprep.mubr.msk.bf16.mxu0 %vm1546_vm4, %v1545_v58  ;;  %1175 = vmatprep.subr.bf16.mxu1 %v1545_v58 }
 0x1f7   : > { %1170 = vmatpush3.bf16.msra.mxu0 %v825_v20 }
 0x2b1   : > { %v664_v63 = vpop.f32.mrf.mxu0 }
 0x2b2   : > { %v669_v0 = vsel %vm668_vm5, %v664_v63, -inf }
 0x2b3   : > { %670 = vmax.xlane.f32.xlu0 %v669_v0  ;;  %v1157_v1 = vpop.f32.mrf.mxu0 }
 0x2b5   : > { %v802_v2 = vpop.f32.mrf.mxu0 }
 0x2b6   : > { %v806_v3 = vsel %vm668_vm5, %v802_v2, -inf }
 0x2b7   : > { %807 = vmax.xlane.f32.xlu0 %v806_v3  ;;  %v1168_v4 = vpop.f32.mrf.mxu0 }
 0x33c   : > { %v671_v5 = vpop.xlane.xlu0 %670 }
 0x33d   : > { %v672_v6 = vsub.f32 %v664_v63, %v671_v5 }
 0x33f   : > { %v673_v7 = vmul.f32 1.442695, %v672_v6 }
 0x340   : > { %v808_v8 = vpop.xlane.xlu0 %807 }
 0x341   : > { %1307 = vpow2.f32 %v673_v7  ;;  %v809_v9 = vsub.f32 %v802_v2, %v808_v8 }
 0x343   : > { %v810_v10 = vmul.f32 1.442695, %v809_v9 }
 0x345   : > { %1309 = vpow2.f32 %v810_v10 }
 0x34e   : > { %v1308_v11 = vpop.eup %1307 }
 0x34f   : > { %v675_v12 = vsel %vm668_vm5, %v1308_v11, 0.0 }
 0x350   : > { %676 = vadd.xlane.f32.xlu1 %v675_v12 }
 0x352   : > { %v1310_v13 = vpop.eup %1309 }
 0x353   : > { %v812_v14 = vsel %vm668_vm5, %v1310_v13, 0.0 }
 0x354   : > { %813 = vadd.xlane.f32.xlu1 %v812_v14 }
 0x3d9   : > { %v677_v21 = vpop.xlane.xlu1 %676 }
 0x3da   : > { %1311 = vrcp.f32 %v677_v21 }
 0x3dd   : > { %v814_v22 = vpop.xlane.xlu1 %813 }
 0x3de   : > { %1313 = vrcp.f32 %v814_v22 }
 0x3e7   : > { %v1312_v23 = vpop.eup %1311 }
 0x3e8   : > { %v679_v24 = vmul.f32 %v1312_v23, %v1308_v11 }
 0x3ea   : > { %680 = vst.msk [vmem:[%s1717_s15] sm:$0xff] %vm668_vm5, %v679_v24  ;;  %v681_v25 = vpack.c.bf16 %v679_v24, %v679_v24 }
 0x3eb   : > { %v1314_v26 = vpop.eup %1313 }
 0x3ec   : > { %v816_v27 = vmul.f32 %v1314_v26, %v1310_v13  ;;  %1161 = vmatmul.mubr.msk.bf16.vlgmr.msra.gmra.mxu1 %vm668_vm5, %v681_v25 }
 0x3ed   : > { %1177 = vmatprep.mubr.msk.bf16.mxu1 %vm1546_vm4, %v1545_v58  ;;  %1176 = vmatpush3.bf16.msra.mxu1 %v876_v30 }
 0x3ee   : > { %1121 = vst.msk [vmem:[%s1717_s15 + $0x8] sm:$0xff] %vm668_vm5, %v816_v27  ;;  %v819_v28 = vpack.c.bf16 %v816_v27, %v816_v27 }
 0x3f0   : > { %1172 = vmatmul.mubr.msk.bf16.vlgmr.msra.gmra.mxu0 %vm668_vm5, %v819_v28 }
 0x4ac   : > { %v724_v31 = vpop.f32.mrf.mxu1 }
 0x4ae   : > { %v1162_v32 = vpop.f32.mrf.mxu1 }
 0x4b0   : > { %v727_v33 = vpop.f32.mrf.mxu1  ;;  %v861_v34 = vpop.f32.mrf.mxu0 }
 0x4b1   : > { %v869_v35 = vpack.c.bf16 %v861_v34, %v724_v31 }
 0x4b2   : > { %v1163_v36 = vpop.f32.mrf.mxu1  ;;  %v1173_v37 = vpop.f32.mrf.mxu0 }
 0x4b3   : > { %1178 = vmatmul.mubr.msk.bf16.vlgmr.msra.gmra.mxu1 %vm591_vm3, %v869_v35 }
 0x4b4   : > { %v864_v38 = vpop.f32.mrf.mxu0 }
 0x4b6   : > { %v1174_v39 = vpop.f32.mrf.mxu0 }
 0x573   : > { %v912_v41 = vpop.f32.mrf.mxu1 }
 0x574   : > { %v919_v42 = vadd.f32 %v912_v41, %v867_v40 }
 0x575   : > { %v1179_v43 = vpop.f32.mrf.mxu1 }
 0x576   : > { %922 = vst.msk [vmem:[#allocation5] sm:$0xff] %vm921_vm8, %v919_v42  ;;  %927 = sbr.rel (%p1124_p4) target bundleno = 1413 (0x585), region = 56 }
 0x577   : > { %v915_v45 = vpop.f32.mrf.mxu1 }
 0x578   : > { %v920_v46 = vadd.f32 %v915_v45, %v868_v44 }
 0x579   : > { %v1180_v47 = vpop.f32.mrf.mxu1 }
 0x57a   : > { %923 = vst.msk [vmem:[#allocation5 + $0x8] sm:$0xff] %vm921_vm8, %v920_v46 }
 0x57b   : > { %v1125_v49 = vld [vmem:[%s1936_s3] ss:$0 sm:$0xff] }
 0x57d   : > { %v928_v48 = vld [vmem:[#allocation5] sm:$0xff] }
 0x57e   : > { %v937_v51 = vadd.f32 %v1125_v49, %v928_v48 }
 0x580   : > { %939 = vst.msk [vmem:[#allocation12] sm:$0xff] %vm921_vm8, %v937_v51 }
 0x581   : > { %v929_v50 = vld [vmem:[#allocation5 + $0x8] sm:$0xff] }
 0x582   : > { %v938_v52 = vadd.f32 %v1125_v49, %v929_v50 }
 0x584   : > { %940 = vst.msk [vmem:[#allocation12 + $0x8] sm:$0xff] %vm921_vm8, %v938_v52 }
 0x585 PF: > { %s1547_s30 = smov [#allocation12]   ;;  %p1953_p0 = scmp.eq.s32.totalorder %s1613_s24, 7 }
 0x586   : > { %s955_s10 = sshll.u32 %s1547_s30, 4  ;;  %s956_s10 = int_to_ptr.vmem [resolvable:$true] %s955_s10 }
 0x587   : > { %s1395_s13 = scalar_lea.vmem %s956_s10, 256  ;;  %p1402_p6 = scmp.lt.s32.totalorder %s956_s10, %s956_s10 }
 0x588   : > { %p1396_p10 = scmp.ne.s32.totalorder %s956_s10, %s1395_s13  ;;  %p1403_p11 = scmp.lt.s32.totalorder %s1395_s13, %s1395_s13 }
 0x58a   : > { %p1397_p1 = pnand %p1396_p10, %p1953_p0  ;;  %p1404_p5 = por %p1403_p11, %p1402_p6 }
 0x58c   : > { %p1398_p2 = pneg %p1397_p1 }
 0x58e   : > { %p1405_p7 = pnand %p1404_p5, %p1398_p2 }
 0x590   : > { %1408 = shalt.err (!%p1405_p7)
}
 0x591   : > { %s1548_s9 = smov 128   ;;  %s1549_s28 = smov 8  }
 0x592   : > { %p1954_p12 = pmov %p1953_p0  ;;  %s1128_s16 = sshll.u32 %s1503_s21, 7 }
 0x593   : > { %s1877_s25 = scalar_lea.hbm %s1938_s5, %s1128_s16  ;;  %s973_s12 = sshll.u32 %s1717_s15, 4  ;;  %s1880_s12 = int_to_ptr.vmem [resolvable:$true] %s973_s12 }
 0x594   : > { %1192 = dma.vmem_to_hbm [thread:$0]  (%p1954_p12), %s956_s10, 256, %s1937_s4, [#allocation8], %s1548_s9, %s1548_s9, %s1549_s28  }
 0x595   : > { %s942_s6 = scalar_lea.sflag [#allocation14], %s1707_s0  ;;  %s1419_s30 = scalar_lea.vmem %s1880_s12, 256 }
 0x596   : > { %p1420_p13 = scmp.ne.s32.totalorder %s1880_s12, %s1419_s30  ;;  %s1550_s13 = smov [#allocation13]  }
 0x597   : > { %s1423_s10 = sshll.u32 %s1550_s13, 4  ;;  %s1424_s10 = int_to_ptr.vmem [resolvable:$false] %s1423_s10 }
 0x598   : > { %p1421_p3 = pnand %p1420_p13, %p1672_p9  ;;  %s1425_s21 = scalar_lea.vmem %s1424_s10, 512 }
 0x599   : > { %p1426_p4 = scmp.lt.s32.totalorder %s1880_s12, %s1424_s10  ;;  %p1427_p10 = scmp.lt.s32.totalorder %s1425_s21, %s1419_s30 }
 0x59a   : > { %p1422_p8 = pneg %p1421_p3 }
 0x59b   : > { %p1428_p0 = por %p1427_p10, %p1426_p4 }
 0x59d   : > { %p1429_p1 = pnand %p1428_p0, %p1422_p8 }
 0x59f   : > { %1432 = shalt.err (!%p1429_p1)
}
 0x5a0   : > { %s1433_s15 = scalar_lea.hbm %s1877_s25, 256  ;;  %s1437_s16 = scalar_lea.hbm %s1938_s5, 2048 }
 0x5a1   : > { %p1434_p2 = scmp.ne.s32.totalorder %s1877_s25, %s1433_s15  ;;  %p1438_p5 = scmp.lt.s32.totalorder %s1877_s25, %s1938_s5 }
 0x5a2   : > { %p1439_p7 = scmp.lt.s32.totalorder %s1437_s16, %s1433_s15 }
 0x5a3   : > { %p1435_p6 = pnand %p1434_p2, %p1672_p9 }
 0x5a4   : > { %p1440_p12 = por %p1439_p7, %p1438_p5 }
 0x5a5   : > { %p1436_p11 = pneg %p1435_p6 }
 0x5a7   : > { %p1441_p13 = pnand %p1440_p12, %p1436_p11 }
 0x5a9   : > { %1444 = shalt.err (!%p1441_p13)
}
 0x5aa   : > { %s1551_s30 = smov 1024   ;;  %p1955_p3 = scmp.eq.s32.totalorder %s1613_s24, 7 }
 0x5ab   : > { %1193 = dma.vmem_to_hbm [thread:$0]  (%p1672_p9), %s1880_s12, 256, %s1877_s25, %s942_s6, %s1548_s9, %s1551_s30, %s1549_s28  }
 0x5ac   : > { %1482 = dma.done.wait (%p1955_p3), [#allocation8], 256   ;;  %p1956_p8 = pmov %p1955_p3 }
 0x5ae   : > { %1484 = vsyncadd (%p1956_p8), [#allocation8], 4294967040 }
 0x5af PF: > { %p1219_p4 = scmp.ge.s32.totalorder %s1511_s23, 2  ;;  %s992_s13 = sand.u32 1, %s1491_s18  }
 0x5b0   : > { %p1957_p10 = scmp.ne.s32.totalorder %s1942_s27, 0  ;;  %s993_s7 = scalar_lea.sflag [#allocation14], %s992_s13 }
 0x5b2   : > { %p1209_p0 = pnand %p1219_p4, %p1957_p10 }
 0x5b4   : > { %p1210_p1 = pneg %p1209_p0 }
 0x5b6   : > { %1486 = dma.done.wait (%p1210_p1), %s993_s7, 256  }
 0x5b7   : > { %1488 = vsyncadd (%p1210_p1), %s993_s7, 4294967040  ;;  %s22_s23 = sadd.s32 1, %s1511_s23   ;;  %s1958_s18 = smov %s1495_s19 }
 0x5b8   : > { %p19_p9 = scmp.ge.s32.totalorder %s22_s23, 10   ;;  %s1959_s19 = smov %s1499_s20 }
 0x5b9   : > { %s1960_s20 = smov %s1682_s11  ;;  %s1961_s21 = smov %s1507_s22 }
 0x5ba   : > { %s1962_s22 = smov %s1964_s29  ;;  %21 = sbr.rel (!%p19_p9) target bundleno = 9 (0x9), region = 132 }
 0x5bf   :  { %998 = vsyncpa [#allocation7], 1 }
 0x5c0   :  { %1000 = vsyncpa [#allocation7 + $0x1], 1 }
 0x5c1   :  { %1001 = vsyncpa [#allocation10], 1 }
 0x5c2   :  { %1002 = vsyncpa [#allocation8], 1 }
 0x5c3   :  { %1004 = vsyncpa [#allocation8 + $0x1], 1 }
 0x5c4   :  { %1005 = vsyncpa [#allocation14], 1 }
 0x5c5   :  { %1007 = vsyncpa [#allocation14 + $0x1], 1 }

</bundles_post_ra>
